<compile_context>
chip_gen: v5e
topology: v5e:2x2
jax: 0.10.0
libtpu: 0.0.40
codegen_flags: <defaults>
</compile_context>

<pallas_src>
import functools

import jax
import jax.numpy as jnp
from jax import lax
from jax.experimental import pallas as pl
from jax.experimental.pallas import tpu as pltpu


def _focal_kernel(x_ref, t_ref, out_ref, acc_ref, *,
                  gamma, alpha, n_rows, n_cols, tn, ts,
                  mask_rows, mask_cols):
    i = pl.program_id(0)
    j = pl.program_id(1)

    @pl.when((i == 0) & (j == 0))
    def _init():
        acc_ref[...] = jnp.zeros_like(acc_ref)
        out_ref[0, 0] = jnp.float32(0.0)

    x = x_ref[...].astype(jnp.float32)       # (tn, C, ts)
    t = t_ref[...].astype(jnp.float32)       # (tn, 1, ts) -> broadcasts over C

    pt = x * t + (1.0 - x) * (1.0 - t)
    logpt = jnp.log(pt + 1e-07)
    at = (1.0 - alpha) * t + alpha * (1.0 - t)
    logpt = logpt * at

    omp = 1.0 - pt
    g = float(gamma)
    if g == int(g) and 1 <= int(g) <= 8:
        # integer-gamma fast path: repeated VPU multiply instead of EUP pow
        focal = omp
        for _ in range(int(g) - 1):
            focal = focal * omp
    elif g == 0.0:
        focal = jnp.ones_like(omp)
    else:
        focal = omp ** jnp.float32(g)

    loss = -focal * logpt                    # (tn, C, ts)

    # Mask ragged tails (partial blocks read unspecified data; zero them out).
    if mask_rows or mask_cols:
        valid = None
        if mask_rows:
            rows = lax.broadcasted_iota(jnp.int32, loss.shape, 0) + i * tn
            valid = rows < n_rows
        if mask_cols:
            cols = lax.broadcasted_iota(jnp.int32, loss.shape, 2) + j * ts
            cmask = cols < n_cols
            valid = cmask if valid is None else (valid & cmask)
        loss = jnp.where(valid, loss, 0.0)

    # Keep the reduction vector-shaped; only reduce in the epilogue.
    acc_ref[...] += loss

    @pl.when((i == pl.num_programs(0) - 1) & (j == pl.num_programs(1) - 1))
    def _finalize():
        out_ref[0, 0] = jnp.sum(acc_ref[...])


def _ceil_to(x, m):
    return -(-x // m) * m


def binary_focal_loss(inp, target, gamma=2, alpha=0.25, size_average=False):
    """Pallas implementation of BinaryFocalLoss.forward (sum or mean)."""
    # ---- shape glue (all free reshapes, no HBM data movement) --------------
    if inp.ndim == 1:
        inp = inp[:, None]
    if inp.ndim == 2:
        N, C = int(inp.shape[0]), int(inp.shape[1])
        S = 1
    else:
        N, C = int(inp.shape[0]), int(inp.shape[1])
        S = 1
        for d in inp.shape[2:]:
            S *= int(d)
    x3 = inp.reshape(N, C, S)                        # native N,C,spatial layout
    t3 = target.astype(jnp.float32).reshape(N, 1, S)  # one label per (n, s)

    # ---- tile selection -----------------------------------------------------
    LANE, SUB = 128, 8
    itemsize = jnp.dtype(x3.dtype).itemsize
    c_pad = _ceil_to(C, SUB)
    BLOCK_BYTES = 2 * 1024 * 1024     # per-buffer budget; fits all generations

    max_ts = max(LANE, (BLOCK_BYTES // (c_pad * 4)) // LANE * LANE)
    ts = S if S <= max_ts else max_ts            # full S, or a multiple of 128
    ts_pad = _ceil_to(ts, LANE)
    row_bytes = c_pad * ts_pad * 4               # padded VMEM bytes per N-row
    tn = max(1, min(N, BLOCK_BYTES // row_bytes))

    grid = (pl.cdiv(N, tn), pl.cdiv(S, ts))
    mask_rows = (N % tn) != 0
    mask_cols = (S % ts) != 0

    kernel = functools.partial(
        _focal_kernel, gamma=float(gamma), alpha=float(alpha),
        n_rows=N, n_cols=S, tn=tn, ts=ts,
        mask_rows=mask_rows, mask_cols=mask_cols)

    total_elems = N * C * S
    cost = pl.CostEstimate(
        flops=16 * total_elems,
        transcendentals=total_elems,
        bytes_accessed=total_elems * itemsize + N * S * 4 + 4)

    total = pl.pallas_call(
        kernel,
        out_shape=jax.ShapeDtypeStruct((1, 1), jnp.float32),
        grid_spec=pltpu.PrefetchScalarGridSpec(
            num_scalar_prefetch=0,
            grid=grid,
            in_specs=[
                pl.BlockSpec((tn, C, ts), lambda i, j: (i, 0, j)),
                pl.BlockSpec((tn, 1, ts), lambda i, j: (i, 0, j)),
            ],
            out_specs=pl.BlockSpec(memory_space=pltpu.SMEM),
            scratch_shapes=[pltpu.VMEM((tn, C, ts), jnp.float32)],
        ),
        compiler_params=pltpu.CompilerParams(
            dimension_semantics=("arbitrary", "arbitrary")),
        cost_estimate=cost,
    )(x3, t3)

    loss_sum = total[0, 0]
    if size_average:
        return loss_sum / jnp.float32(total_elems)
    return loss_sum


def _reference(inp, target, gamma=2, alpha=0.25, size_average=False):
    target = target.astype(jnp.float32)
    if inp.ndim == 1:
        inp = inp[:, None]
    if inp.ndim > 2:
        n, c = inp.shape[0], inp.shape[1]
        inp = inp.reshape(n, c, -1)
        inp = jnp.transpose(inp, (0, 2, 1)).reshape(-1, c)
    target = target.reshape(-1, 1)
    inp = inp.astype(jnp.float32)
    pt = inp * target + (1 - inp) * (1 - target)
    logpt = jnp.log(pt + 1e-07)
    at = (1 - alpha) * target + alpha * (1 - target)
    loss = -1 * (1 - pt) ** gamma * (logpt * at)
    return loss.mean() if size_average else loss.sum()


if __name__ == "__main__":
    key = jax.random.PRNGKey(0)
    k1, k2 = jax.random.split(key)

    # input: NCHW probabilities (the loss expects probabilities, not logits)
    x = jax.nn.sigmoid(jax.random.normal(k1, (2, 4, 16, 16), dtype=jnp.float32))
    # target: one binary label per spatial location -> numel == N*H*W
    t = (jax.random.uniform(k2, (2, 16, 16)) > 0.5).astype(jnp.float32)

    out = binary_focal_loss(x, t, gamma=2, alpha=0.25, size_average=False)
    out = jax.block_until_ready(out)
    ref = _reference(x, t, gamma=2, alpha=0.25, size_average=False)
    assert jnp.allclose(out, ref, rtol=1e-4, atol=1e-4), (out, ref)

    # also exercise the size_average (mean) path
    out_m = jax.block_until_ready(binary_focal_loss(x, t, size_average=True))
    ref_m = _reference(x, t, size_average=True)
    assert jnp.allclose(out_m, ref_m, rtol=1e-4, atol=1e-6), (out_m, ref_m)

    print("KERNEL_OK")
</pallas_src>

<mosaic_0001>
module attributes {stable_mosaic.version = 11 : i64} {
  func.func @_focal_kernel(%arg0: i32, %arg1: i32, %arg2: memref<2x4x256xf32, #tpu.memory_space<vmem>>, %arg3: memref<2x1x256xf32, #tpu.memory_space<vmem>>, %arg4: memref<1x1xf32, #tpu.memory_space<smem>>, %arg5: memref<2x4x256xf32, #tpu.memory_space<vmem>>) attributes {dimension_semantics = [#tpu.dimension_semantics<arbitrary>, #tpu.dimension_semantics<arbitrary>], iteration_bounds = array<i64: 1, 1>, scalar_prefetch = 0 : i64, scratch_operands = 1 : i64, tpu.core_type = #tpu.core_type<tc>, window_params = [{transform_indices = @transform_0, window_bounds = array<i64: 2, 4, 256>}, {transform_indices = @transform_1, window_bounds = array<i64: 2, 1, 256>}, {transform_indices = @transform_2, window_bounds = array<i64: 1, 1>}]} {
    %c0_i32 = arith.constant 0 : i32
    %0 = arith.cmpi eq, %arg0, %c0_i32 : i32
    %c0_i32_0 = arith.constant 0 : i32
    %1 = arith.cmpi eq, %arg1, %c0_i32_0 : i32
    %2 = arith.andi %0, %1 : i1
    %3 = arith.extui %2 : i1 to i32
    %c0_i32_1 = arith.constant 0 : i32
    %4 = arith.cmpi ne, %3, %c0_i32_1 : i32
    scf.if %4 {
      %cst_23 = arith.constant 0.000000e+00 : f32
      %42 = vector.broadcast %cst_23 : f32 to vector<2x4x256xf32>
      %c0_24 = arith.constant 0 : index
      %c0_25 = arith.constant 0 : index
      %c0_26 = arith.constant 0 : index
      %43 = vector.load %arg5[%c0_24, %c0_25, %c0_26] : memref<2x4x256xf32, #tpu.memory_space<vmem>>, vector<2x4x256xf32>
      tpu.vector_store %arg5[%c0_24, %c0_25, %c0_26], %42 {strides = array<i32>} : memref<2x4x256xf32, #tpu.memory_space<vmem>>, vector<2x4x256xf32>,
      %cst_27 = arith.constant 0.000000e+00 : f32
      %c0_28 = arith.constant 0 : index
      %c0_29 = arith.constant 0 : index
      %44 = memref.load %arg4[%c0_28, %c0_29] : memref<1x1xf32, #tpu.memory_space<smem>>
      memref.store %cst_27, %arg4[%c0_28, %c0_29] : memref<1x1xf32, #tpu.memory_space<smem>>
    } else {
    }
    %c0 = arith.constant 0 : index
    %c0_2 = arith.constant 0 : index
    %c0_3 = arith.constant 0 : index
    %5 = vector.load %arg2[%c0, %c0_2, %c0_3] : memref<2x4x256xf32, #tpu.memory_space<vmem>>, vector<2x4x256xf32>
    %c0_4 = arith.constant 0 : index
    %c0_5 = arith.constant 0 : index
    %c0_6 = arith.constant 0 : index
    %6 = vector.load %arg3[%c0_4, %c0_5, %c0_6] : memref<2x1x256xf32, #tpu.memory_space<vmem>>, vector<2x1x256xf32>
    %7 = vector.broadcast %6 : vector<2x1x256xf32> to vector<2x4x256xf32>
    %8 = arith.mulf %5, %7 : vector<2x4x256xf32>
    %cst = arith.constant 1.000000e+00 : f32
    %9 = vector.broadcast %cst : f32 to vector<2x4x256xf32>
    %10 = arith.subf %9, %5 : vector<2x4x256xf32>
    %cst_7 = arith.constant 1.000000e+00 : f32
    %11 = vector.broadcast %cst_7 : f32 to vector<2x1x256xf32>
    %12 = arith.subf %11, %6 : vector<2x1x256xf32>
    %13 = vector.broadcast %12 : vector<2x1x256xf32> to vector<2x4x256xf32>
    %14 = arith.mulf %10, %13 : vector<2x4x256xf32>
    %15 = arith.addf %8, %14 : vector<2x4x256xf32>
    %cst_8 = arith.constant 1.000000e-07 : f32
    %16 = vector.broadcast %cst_8 : f32 to vector<2x4x256xf32>
    %17 = arith.addf %15, %16 : vector<2x4x256xf32>
    %18 = math.log %17 : vector<2x4x256xf32>
    %cst_9 = arith.constant 7.500000e-01 : f32
    %19 = vector.broadcast %cst_9 : f32 to vector<2x1x256xf32>
    %20 = arith.mulf %19, %6 : vector<2x1x256xf32>
    %cst_10 = arith.constant 1.000000e+00 : f32
    %21 = vector.broadcast %cst_10 : f32 to vector<2x1x256xf32>
    %22 = arith.subf %21, %6 : vector<2x1x256xf32>
    %cst_11 = arith.constant 2.500000e-01 : f32
    %23 = vector.broadcast %cst_11 : f32 to vector<2x1x256xf32>
    %24 = arith.mulf %23, %22 : vector<2x1x256xf32>
    %25 = arith.addf %20, %24 : vector<2x1x256xf32>
    %26 = vector.broadcast %25 : vector<2x1x256xf32> to vector<2x4x256xf32>
    %27 = arith.mulf %18, %26 : vector<2x4x256xf32>
    %cst_12 = arith.constant 1.000000e+00 : f32
    %28 = vector.broadcast %cst_12 : f32 to vector<2x4x256xf32>
    %29 = arith.subf %28, %15 : vector<2x4x256xf32>
    %30 = arith.mulf %29, %29 : vector<2x4x256xf32>
    %cst_13 = arith.constant 0.000000e+00 : f32
    %31 = vector.broadcast %cst_13 : f32 to vector<2x4x256xf32>
    %32 = arith.subf %31, %30 : vector<2x4x256xf32>
    %33 = arith.mulf %32, %27 : vector<2x4x256xf32>
    %c0_14 = arith.constant 0 : index
    %c0_15 = arith.constant 0 : index
    %c0_16 = arith.constant 0 : index
    %34 = vector.load %arg5[%c0_14, %c0_15, %c0_16] : memref<2x4x256xf32, #tpu.memory_space<vmem>>, vector<2x4x256xf32>
    %35 = arith.addf %34, %33 : vector<2x4x256xf32>
    %c0_17 = arith.constant 0 : index
    %c0_18 = arith.constant 0 : index
    %c0_19 = arith.constant 0 : index
    %36 = vector.load %arg5[%c0_17, %c0_18, %c0_19] : memref<2x4x256xf32, #tpu.memory_space<vmem>>, vector<2x4x256xf32>
    tpu.vector_store %arg5[%c0_17, %c0_18, %c0_19], %35 {strides = array<i32>} : memref<2x4x256xf32, #tpu.memory_space<vmem>>, vector<2x4x256xf32>,
    %c0_i32_20 = arith.constant 0 : i32
    %37 = arith.cmpi eq, %arg0, %c0_i32_20 : i32
    %c0_i32_21 = arith.constant 0 : i32
    %38 = arith.cmpi eq, %arg1, %c0_i32_21 : i32
    %39 = arith.andi %37, %38 : i1
    %40 = arith.extui %39 : i1 to i32
    %c0_i32_22 = arith.constant 0 : i32
    %41 = arith.cmpi ne, %40, %c0_i32_22 : i32
    scf.if %41 {
      %c0_23 = arith.constant 0 : index
      %c0_24 = arith.constant 0 : index
      %c0_25 = arith.constant 0 : index
      %42 = vector.load %arg5[%c0_23, %c0_24, %c0_25] : memref<2x4x256xf32, #tpu.memory_space<vmem>>, vector<2x4x256xf32>
      %43 = vector.shape_cast %42 : vector<2x4x256xf32> to vector<1x2x4x256xf32>
      %cst_26 = arith.constant dense<0.000000e+00> : vector<1xf32>
      %44 = vector.multi_reduction <add>, %43, %cst_26 [1, 2, 3] : vector<1x2x4x256xf32> to vector<1xf32>
      %45 = vector.shape_cast %44 : vector<1xf32> to vector<1x1x1x1xf32>
      %46 = vector.extract %45[0, 0, 0, 0] : f32 from vector<1x1x1x1xf32>
      %c0_27 = arith.constant 0 : index
      %c0_28 = arith.constant 0 : index
      %47 = memref.load %arg4[%c0_27, %c0_28] : memref<1x1xf32, #tpu.memory_space<smem>>
      memref.store %46, %arg4[%c0_27, %c0_28] : memref<1x1xf32, #tpu.memory_space<smem>>
    } else {
    }
    return
  }
  func.func @transform_0(%arg0: i32, %arg1: i32) -> (i32, i32, i32) {
    %c0_i32 = arith.constant 0 : i32
    %c0_i32_0 = arith.constant 0 : i32
    return %arg0, %c0_i32, %arg1 : i32, i32, i32
  }
  func.func @transform_1(%arg0: i32, %arg1: i32) -> (i32, i32, i32) {
    %c0_i32 = arith.constant 0 : i32
    %c0_i32_0 = arith.constant 0 : i32
    return %arg0, %c0_i32, %arg1 : i32, i32, i32
  }
  func.func @transform_2(%arg0: i32, %arg1: i32) -> (i32, i32) {
    %c0_i32 = arith.constant 0 : i32
    %c0_i32_0 = arith.constant 0 : i32
    %c0_i32_1 = arith.constant 0 : i32
    return %c0_i32, %c0_i32_0 : i32, i32
  }
}

</mosaic_0001>

<bundles_post_ra>
// kernel: tpu_custom_call.1
= control target key start
LH: loop header
LB: loop body
LE: loop exit
PB: predicated region body
PF: predicated region fallthrough
CT: control target
= control target key end

     0   :  { %7 = vsyncpa [#allocation4], 0  ;;  %s306_s0 = inlined_call_operand.hbm [shape: f32[2,4,256], index: 0, kind: input, shape index: {}]   ;;  %s307_s1 = inlined_call_operand.hbm [shape: f32[2,1,256], index: 1, kind: input, shape index: {}]   ;;  %s308_s2 = inlined_call_operand.hbm [shape: f32[1,1], index: 2, kind: output, shape index: {}]  }
   0x1   :  { %8 = vsyncpa [#allocation7], 0 }
   0x2   :  { %9 = vsyncpa [#allocation5], 0  ;;  %s14_s11 = sshll.u32 %s306_s0, 4  ;;  %s265_s12 = smov [#allocation3]   ;;  %s15_s11 = int_to_ptr.hbm [resolvable:$true] %s14_s11 }
   0x3   :  { %s16_s13 = sshll.u32 %s265_s12, 4  ;;  %s27_s16 = sshll.u32 %s307_s1, 4  ;;  %s17_s13 = int_to_ptr.vmem [resolvable:$true] %s16_s13  ;;  %s28_s16 = int_to_ptr.hbm [resolvable:$true] %s27_s16 }
   0x4   :  { %s266_s17 = smov 128   ;;  %s267_s18 = smov 8  }
   0x5   :  { %22 = dma.hbm_to_vmem [thread:$0]  %s15_s11, 256, %s17_s13, [#allocation4], %s266_s17, %s266_s17, %s267_s18  }
   0x6   :  { %s268_s19 = smov [#allocation6]   ;;  %s269_s21 = smov 32  }
   0x7   :  { %s29_s20 = sshll.u32 %s268_s19, 4  ;;  %s270_s22 = smov 2   ;;  %s30_s20 = int_to_ptr.vmem [resolvable:$true] %s29_s20 }
   0x8   :  { %35 = dma.hbm_to_vmem [thread:$0]  %s28_s16, 64, %s30_s20, [#allocation7], %s269_s21, %s269_s21, %s270_s22  }
   0x9   :  { %259 = dma.done.wait [#allocation4], 256  }
   0xa   :  { %260 = vsyncadd [#allocation4], 4294967040 }
   0xb   :  { %261 = dma.done.wait [#allocation7], 64  }
   0xc   :  { %262 = vsyncadd [#allocation7], 4294967232  ;;  %v54_v0 = vld [vmem:[#allocation3] sm:$0xff]  ;;  %v55_v1 = vld [vmem:[#allocation3 + $0x8] sm:$0xff]  ;;  %vm66_vm0 = vcmask 1043456   ;;  %s173_s23 = sshll.u32 %s308_s2, 4  ;;  %s174_s23 = int_to_ptr.hbm [resolvable:$true] %s173_s23 }
   0xd   :  { %v56_v2 = vld [vmem:[#allocation6] sm:$0x3]  ;;  %v57_v3 = vld [vmem:[#allocation6 + $0x2] sm:$0x3]  ;;  %v73_v11 = vsub.f32 1.0, %v54_v0  ;;  %v74_v12 = vsub.f32 1.0, %v55_v1 }
   0xe   :  { %v60_v4 = vperm.slane %v56_v2, 0  ;;  %v61_v5 = vperm.slane %v56_v2, 1  ;;  %v62_v6 = vperm.slane %v57_v3, 0  ;;  %v63_v7 = vperm.slane %v57_v3, 1  ;;  %s271_s25 = smov [#allocation8]  }
   0xf   :  { %v75_v8 = vsub.f32 1.0, %v56_v2  ;;  %v76_v9 = vsub.f32 1.0, %v57_v3  ;;  %v99_v16 = vmul.f32 0.75, %v56_v2  ;;  %v100_v23 = vmul.f32 0.75, %v57_v3 }
  0x10   :  { %v64_v10 = vrot.slane %v61_v5, 4  ;;  %v65_v13 = vrot.slane %v63_v7, 4 }
  0x11   :  { %v79_v14 = vperm.slane %v75_v8, 0  ;;  %v80_v15 = vperm.slane %v75_v8, 1  ;;  %v81_v18 = vperm.slane %v76_v9, 0  ;;  %v82_v19 = vperm.slane %v76_v9, 1 }
  0x12   :  { %v67_v17 = vsel %vm66_vm0, %v60_v4, %v64_v10  ;;  %v101_v20 = vmul.f32 0.25, %v75_v8  ;;  %v68_v21 = vsel %vm66_vm0, %v62_v6, %v65_v13  ;;  %v102_v24 = vmul.f32 0.25, %v76_v9 }
  0x13   :  { %v83_v22 = vrot.slane %v80_v15, 4  ;;  %v71_v25 = vmul.f32 %v67_v17, %v54_v0  ;;  %v84_v26 = vrot.slane %v82_v19, 4  ;;  %v72_v27 = vmul.f32 %v68_v21, %v55_v1 }
  0x14   :  { %v103_v31 = vadd.f32 %v101_v20, %v99_v16  ;;  %v104_v33 = vadd.f32 %v102_v24, %v100_v23 }
  0x15   :  { %v85_v28 = vsel %vm66_vm0, %v79_v14, %v83_v22  ;;  %v86_v29 = vsel %vm66_vm0, %v81_v18, %v84_v26 }
  0x16   :  { %v89_v30 = vmul.f32 %v85_v28, %v73_v11  ;;  %v90_v32 = vmul.f32 %v86_v29, %v74_v12  ;;  %v108_v37 = vperm.slane %v103_v31, 1  ;;  %v110_v39 = vperm.slane %v104_v33, 1 }
  0x17   :  { %v107_v42 = vperm.slane %v103_v31, 0  ;;  %v109_v44 = vperm.slane %v104_v33, 0 }
  0x18   :  { %v91_v34 = vadd.f32 %v89_v30, %v71_v25  ;;  %v92_v35 = vadd.f32 %v90_v32, %v72_v27  ;;  %v111_v43 = vrot.slane %v108_v37, 4  ;;  %v112_v45 = vrot.slane %v110_v39, 4 }
  0x1a   :  { %v93_v36 = vadd.f32 1e-07, %v91_v34  ;;  %v94_v38 = vadd.f32 1e-07, %v92_v35  ;;  %v119_v40 = vsub.f32 1.0, %v91_v34  ;;  %v120_v41 = vsub.f32 1.0, %v92_v35 }
  0x1b   :  { %v113_v49 = vsel %vm66_vm0, %v107_v42, %v111_v43  ;;  %v114_v52 = vsel %vm66_vm0, %v109_v44, %v112_v45 }
  0x1c   :  { %195 = vlog2.f32 %v93_v36  ;;  %v121_v46 = vmul.f32 %v119_v40, %v119_v40  ;;  %v122_v47 = vmul.f32 %v120_v41, %v120_v41 }
  0x1d   :  { %197 = vlog2.f32 %v94_v38 }
  0x1e   :  { %v123_v53 = vsub.f32 0.0, %v121_v46  ;;  %v124_v55 = vsub.f32 0.0, %v122_v47 }
  0x22   :  { %v196_v48 = vpop.eup %195 }
  0x23   :  { %v198_v50 = vpop.eup %197  ;;  %v96_v51 = vmul.f32 0.6931472, %v196_v48 }
  0x24   :  { %v98_v54 = vmul.f32 0.6931472, %v198_v50 }
  0x25   :  { %v117_v56 = vmul.f32 %v113_v49, %v96_v51 }
  0x26   :  { %v118_v57 = vmul.f32 %v114_v52, %v98_v54 }
  0x27   :  { %v125_v58 = vmul.f32 %v123_v53, %v117_v56 }
  0x28   :  { %v126_v59 = vmul.f32 %v124_v55, %v118_v57 }
  0x29   :  { %139 = vst [vmem:[#allocation1] ss:$2 sm:$0xff] %v125_v58 }
  0x2a   :  { %143 = vst [vmem:[#allocation1 + $0x10] ss:$2 sm:$0xff] %v126_v59 }
  0x30   :  { %v140_v60 = vld.sshfl [vmem:[#allocation1] sm:$0xff pattern:$0x75316420]  ;;  %v141_v61 = vld.sshfl [vmem:[#allocation1 + $0x8] sm:$0xff pattern:$0x75316420] }
  0x31   :  { %v144_v62 = vld.sshfl [vmem:[#allocation1 + $0x10] sm:$0xff pattern:$0x75316420]  ;;  %v145_v63 = vld.sshfl [vmem:[#allocation1 + $0x18] sm:$0xff pattern:$0x75316420] }
  0x32   :  { %v150_v0 = vsel %vm66_vm0, %v140_v60, 0.0  ;;  %v151_v1 = vsel %vm66_vm0, %v141_v61, 0.0  ;;  %v153_v2 = vsel %vm66_vm0, %v144_v62, 0.0  ;;  %v155_v4 = vsel %vm66_vm0, %v145_v63, 0.0 }
  0x33   :  { %v152_v3 = vadd.f32 %v151_v1, %v150_v0 }
  0x35   :  { %v154_v5 = vadd.f32 %v153_v2, %v152_v3 }
  0x37   :  { %v156_v6 = vadd.f32 %v155_v4, %v154_v5 }
  0x39   :  { %157 = vadd.xlane.f32.xlu0 %v156_v6 }
  0xac   :  { %v158_v7 = vpop.xlane.xlu0 %157 }
  0xad   :  { %v159_v8 = vrot.slane %v158_v7, 4 }
  0xaf   :  { %v160_v9 = vadd.f32 %v159_v8, %v158_v7 }
  0xb1   :  { %v161_v10 = vrot.slane %v160_v9, 2 }
  0xb3   :  { %v162_v11 = vadd.f32 %v161_v10, %v160_v9 }
  0xb5   :  { %v163_v12 = vrot.slane %v162_v11, 1 }
  0xb7   :  { %v164_v13 = vadd.f32 %v163_v12, %v162_v11 }
  0xb9   :  { %185 = vpush %v164_v13 }
  0xea   :  { %s186_s24 = spop %185 }
  0xeb   :  { %167 = sst [smem:[#allocation8]] %s186_s24 }
  0xec   :  { %176 = dma.smem_to_hbm %s271_s25, 16, %s174_s23, [#allocation5]  }
  0xed   :  { %263 = dma.done.wait [#allocation5], 16  }
  0xee   :  { %264 = vsyncadd [#allocation5], 4294967280 }
  0xef   :  { %181 = sfence }
  0xf0   :  { %182 = vsyncpa [#allocation4], 1 }
  0xf1   :  { %183 = vsyncpa [#allocation7], 1 }
  0xf2   :  { %184 = vsyncpa [#allocation5], 1 }

</bundles_post_ra>
